<compile_context>
chip_gen: v6e
topology: v6e:2x2x1
jax: 0.10.0
libtpu: 0.0.40
codegen_flags: <defaults>
</compile_context>

<pallas_src>
import jax
import jax.numpy as jnp
from jax.experimental import pallas as pl
from jax.experimental.pallas import tpu as pltpu

_LANES = 128
_TARGET_BLOCK_BYTES = 4 * 1024 * 1024   # ~4 MiB per block, dtype-independent
_MIN_GRID_STEPS = 2                     # keep both v7x TensorCores busy
_VMEM_LIMIT_BYTES = 32 * 1024 * 1024    # safe on v5e/v6e/v7x; > v5e's 16 MiB default
_MIN_PALLAS_ELEMS = 64 * 1024           # below this, a fused XLA multiply is cheaper


def _scale_kernel(scale_ref, x_ref, o_ref):
    # scale_ref: SMEM (1,) f32 ; x_ref / o_ref: VMEM tiles (block_rows, 128)
    # Review: leave the body alone -- one vmul + one cast per vreg is nowhere
    # near saturating VALU/vst; HBM bandwidth is the binding resource.
    s = scale_ref[0]
    o_ref[...] = (x_ref[...] * s).astype(o_ref.dtype)


def _round_up(v, m):
    return ((v + m - 1) // m) * m


def _xla_scale(x, scale_f32, out_dtype):
    return (x.astype(jnp.float32) * scale_f32[0]).astype(out_dtype)


def scale_forward(x, scale, *, target_block_bytes=_TARGET_BLOCK_BYTES,
                  min_pallas_elems=_MIN_PALLAS_ELEMS):
    """Pallas equivalent of Scale.forward: x * scale. `scale` is a (1,) f32 param."""
    orig_shape = x.shape
    orig_dtype = x.dtype
    n = x.size

    scale_f32 = jnp.asarray(scale, dtype=jnp.float32).reshape((1,))

    itemsize = jnp.dtype(orig_dtype).itemsize

    # Only stream supported float dtypes through the Pallas path; everything
    # else (ints, f64) follows plain promotion semantics via XLA.
    # TODO(synk): integer inputs follow JAX promotion here rather than being
    # forced back to the input dtype; the module is only used on float maps.
    if (not jnp.issubdtype(orig_dtype, jnp.floating)) or itemsize not in (1, 2, 4):
        return x * scale_f32[0]

    # Small-tensor fast path: pallas_call launch + reshape plumbing would dwarf
    # the single fused multiply XLA emits.
    if n == 0 or n < min_pallas_elems or n < _LANES:
        return jnp.reshape(_xla_scale(x, scale_f32, orig_dtype), orig_shape)

    # ---- Lane-dense slab, no full-array pad/slice on the ragged path -------
    x_flat = jnp.reshape(x, (-1,))               # zero-copy
    aligned = (n // _LANES) * _LANES
    tail = n - aligned
    rows = aligned // _LANES

    x_main = x_flat[:aligned] if tail else x_flat
    x2d = jnp.reshape(x_main, (rows, _LANES))

    # ---- Block sizing: byte-targeted, dtype-aware, >= 2 roughly-equal blocks
    packing = 4 // itemsize                      # 1 (f32), 2 (bf16), 4 (int8/fp8)
    min_rows = 8 * packing                       # native sublane packing
    target_rows = max(min_rows,
                      (target_block_bytes // (_LANES * itemsize)) // min_rows * min_rows)

    if rows <= min_rows * _MIN_GRID_STEPS:
        # Tiny slab: one full-extent block (exempt from the (8,128) rule).
        block_rows = rows
    else:
        num_blocks = max(_MIN_GRID_STEPS, pl.cdiv(rows, target_rows))
        block_rows = _round_up(pl.cdiv(rows, num_blocks), min_rows)
        if block_rows >= rows:                   # safety: never exceed the array
            block_rows = rows

    grid = (pl.cdiv(rows, block_rows),)

    cost = pl.CostEstimate(
        flops=int(aligned),
        transcendentals=0,
        bytes_accessed=int(2 * aligned * itemsize + 4),
    )

    out2d = pl.pallas_call(
        _scale_kernel,
        out_shape=jax.ShapeDtypeStruct((rows, _LANES), orig_dtype),
        grid=grid,
        in_specs=[
            pl.BlockSpec(memory_space=pltpu.SMEM),                 # scale (1,) f32
            pl.BlockSpec((block_rows, _LANES), lambda i: (i, 0)),  # x block
        ],
        out_specs=pl.BlockSpec((block_rows, _LANES), lambda i: (i, 0)),
        compiler_params=pltpu.CompilerParams(
            dimension_semantics=("parallel",),       # shard grid across TCs (v7x)
            vmem_limit_bytes=_VMEM_LIMIT_BYTES,      # 4 MiB blocks x 4 bufs on v5e
        ),
        cost_estimate=cost,
    )(scale_f32, x2d)

    out_main = jnp.reshape(out2d, (-1,))
    if tail:
        out_tail = _xla_scale(x_flat[aligned:], scale_f32, orig_dtype)
        out_flat = jnp.concatenate([out_main, out_tail])
    else:
        out_flat = out_main
    return jnp.reshape(out_flat, orig_shape)


if __name__ == "__main__":
    key = jax.random.PRNGKey(0)

    # Deterministic parameter, matching nn.Parameter(FloatTensor([init_value])).
    init_value = 1.0
    scale = jnp.asarray([init_value * 0.5], dtype=jnp.float32)  # non-trivial scale

    # 1) Small conv-head feature map (NCHW) forced through the Pallas kernel.
    x_small = jax.random.normal(key, (2, 4, 16, 16), dtype=jnp.float32)
    out_small = jax.block_until_ready(
        scale_forward(x_small, scale, min_pallas_elems=0))
    assert out_small.shape == x_small.shape and out_small.dtype == x_small.dtype
    assert jnp.allclose(out_small, x_small * scale[0], atol=1e-6, rtol=1e-6)

    # 2) Element count not a multiple of 128: exercises the prefix + tail path
    #    (no full-array pad or post-slice).
    k1, k2 = jax.random.split(key)
    x_ragged = jax.random.normal(k1, (2, 3, 17, 19), dtype=jnp.float32)
    out_ragged = jax.block_until_ready(
        scale_forward(x_ragged, scale, min_pallas_elems=0))
    assert out_ragged.shape == x_ragged.shape
    assert jnp.allclose(out_ragged, x_ragged * scale[0], atol=1e-6, rtol=1e-6)

    # 3) Larger feature map: multi-block (>=2, roughly equal) grid, zero-copy
    #    reshapes only.
    x_big = jax.random.normal(k2, (2, 64, 80, 80), dtype=jnp.float32)
    out_big = jax.block_until_ready(scale_forward(x_big, scale))
    assert out_big.shape == x_big.shape and out_big.dtype == x_big.dtype
    assert jnp.allclose(out_big, x_big * scale[0], atol=1e-6, rtol=1e-6)

    # 4) bf16 stream: byte-targeted blocks keep DMA-per-step at ~4 MiB.
    x_bf16 = jax.random.normal(k1, (2, 64, 80, 80), dtype=jnp.bfloat16)
    out_bf16 = jax.block_until_ready(scale_forward(x_bf16, scale))
    assert out_bf16.shape == x_bf16.shape and out_bf16.dtype == jnp.bfloat16
    assert jnp.allclose(out_bf16.astype(jnp.float32),
                        x_bf16.astype(jnp.float32) * scale[0], atol=1e-2, rtol=1e-2)

    print("KERNEL_OK")
</pallas_src>

<mosaic_0001>
module attributes {stable_mosaic.version = 11 : i64} {
  func.func @_scale_kernel(%arg0: i32, %arg1: memref<1xf32, #tpu.memory_space<smem>>, %arg2: memref<16x128xf32, #tpu.memory_space<vmem>>, %arg3: memref<16x128xf32, #tpu.memory_space<vmem>>) attributes {dimension_semantics = [#tpu.dimension_semantics<parallel>], iteration_bounds = array<i64: 1>, scalar_prefetch = 0 : i64, scratch_operands = 0 : i64, tpu.core_type = #tpu.core_type<tc>, window_params = [{transform_indices = @transform_0, window_bounds = array<i64: 1>}, {transform_indices = @transform_1, window_bounds = array<i64: 16, 128>}, {transform_indices = @transform_2, window_bounds = array<i64: 16, 128>}]} {
    %c0 = arith.constant 0 : index
    %0 = memref.load %arg1[%c0] : memref<1xf32, #tpu.memory_space<smem>>
    %c0_0 = arith.constant 0 : index
    %c0_1 = arith.constant 0 : index
    %1 = vector.load %arg2[%c0_0, %c0_1] : memref<16x128xf32, #tpu.memory_space<vmem>>, vector<16x128xf32>
    %2 = vector.broadcast %0 : f32 to vector<16x128xf32>
    %3 = arith.mulf %1, %2 : vector<16x128xf32>
    %c0_2 = arith.constant 0 : index
    %c0_3 = arith.constant 0 : index
    %4 = vector.load %arg3[%c0_2, %c0_3] : memref<16x128xf32, #tpu.memory_space<vmem>>, vector<16x128xf32>
    tpu.vector_store %arg3[%c0_2, %c0_3], %3 {strides = array<i32>} : memref<16x128xf32, #tpu.memory_space<vmem>>, vector<16x128xf32>,
    return
  }
  func.func @transform_0(%arg0: i32) -> i32 {
    %c0_i32 = arith.constant 0 : i32
    %c0_i32_0 = arith.constant 0 : i32
    return %c0_i32 : i32
  }
  func.func @transform_1(%arg0: i32) -> (i32, i32) {
    %c0_i32 = arith.constant 0 : i32
    %c0_i32_0 = arith.constant 0 : i32
    return %arg0, %c0_i32 : i32, i32
  }
  func.func @transform_2(%arg0: i32) -> (i32, i32) {
    %c0_i32 = arith.constant 0 : i32
    %c0_i32_0 = arith.constant 0 : i32
    return %arg0, %c0_i32 : i32, i32
  }
}

</mosaic_0001>

<bundles_post_ra>
// kernel: tpu_custom_call.1
= control target key start
LH: loop header
LB: loop body
LE: loop exit
PB: predicated region body
PF: predicated region fallthrough
CT: control target
= control target key end

     0   :  { %8 = vsyncpa [#allocation4], 0  ;;  %s128_s0 = inlined_call_operand.<no memory space> [shape: f32[1], index: 0, kind: input, shape index: {}]   ;;  %s129_s1 = inlined_call_operand.hbm [shape: f32[16,128], index: 1, kind: input, shape index: {}]   ;;  %s130_s2 = inlined_call_operand.hbm [shape: f32[16,128], index: 2, kind: output, shape index: {}]  }
   0x1   :  { %9 = vsyncpa [#allocation5], 0  ;;  %s100_s9 = smov [#allocation3]  }
   0x2   :  { %s17_s10 = sshll.u32 %s100_s9, 4  ;;  %s18_s10 = int_to_ptr.vmem [resolvable:$true] %s17_s10 }
   0x3   :  { %s64_s11 = scalar_lea.vmem %s18_s10, 256  ;;  %p69_p1 = scmp.lt.s32.totalorder %s18_s10, %s18_s10 }
   0x4   :  { %p65_p0 = scmp.ne.s32.totalorder %s18_s10, %s64_s11  ;;  %p70_p2 = scmp.lt.s32.totalorder %s64_s11, %s64_s11 }
   0x6   :  { %p71_p3 = por %p70_p2, %p69_p1 }
   0x8   :  { %p72_p4 = pnand %p71_p3, %p65_p0 }
   0xa   :  { %75 = shalt.err (!%p72_p4)
}
   0xb   :  { %s101_s12 = smov 128   ;;  %s102_s13 = smov 8  }
   0xc   :  { %23 = dma.hbm_to_vmem [thread:$0]  %s129_s1, 256, %s18_s10, [#allocation4], %s101_s12, %s101_s12, %s102_s13  }
   0xd   :  { %96 = dma.done.wait [#allocation4], 256  }
   0xe   :  { %97 = vsyncadd [#allocation4], 4294967040  ;;  %v30_v0 = vstv %s128_s0  ;;  %s103_s18 = smov [#allocation6]   ;;  %v28_v1 = vld [vmem:[#allocation3] sm:$0xff]  ;;  %v29_v2 = vld [vmem:[#allocation3 + $0x8] sm:$0xff] }
   0xf   :  { %s40_s19 = sshll.u32 %s103_s18, 4  ;;  %v31_v3 = vmul.f32 %v30_v0, %v28_v1  ;;  %v32_v4 = vmul.f32 %v30_v0, %v29_v2  ;;  %s41_s19 = int_to_ptr.vmem [resolvable:$true] %s40_s19 }
  0x10   :  { %s76_s20 = scalar_lea.vmem %s41_s19, 256  ;;  %p81_p6 = scmp.lt.s32.totalorder %s41_s19, %s41_s19 }
  0x11   :  { %33 = vst [vmem:[#allocation6] sm:$0xff] %v31_v3  ;;  %34 = vst [vmem:[#allocation6 + $0x8] sm:$0xff] %v32_v4  ;;  %p77_p5 = scmp.ne.s32.totalorder %s41_s19, %s76_s20  ;;  %p82_p7 = scmp.lt.s32.totalorder %s76_s20, %s76_s20 }
  0x13   :  { %p83_p8 = por %p82_p7, %p81_p6 }
  0x15   :  { %p84_p9 = pnand %p83_p8, %p77_p5 }
  0x17   :  { %87 = shalt.err (!%p84_p9)
}
  0x18   :  { %46 = dma.vmem_to_hbm [thread:$0]  %s41_s19, 256, %s130_s2, [#allocation5], %s101_s12, %s101_s12, %s102_s13  }
  0x19   :  { %98 = dma.done.wait [#allocation5], 256  }
  0x1a   :  { %99 = vsyncadd [#allocation5], 4294967040 }
  0x1b   :  { %50 = vsyncpa [#allocation4], 1 }
  0x1c   :  { %51 = vsyncpa [#allocation5], 1 }

</bundles_post_ra>
